<compile_context>
chip_gen: v7x
topology: tpu7x:2x2x1
jax: 0.10.0
libtpu: 0.0.40
codegen_flags: <defaults>
</compile_context>

<pallas_src>
from typing import NamedTuple

import jax
import jax.numpy as jnp
from jax import lax
from jax.experimental import pallas as pl
from jax.experimental.pallas import tpu as pltpu


_MiB = 1024 * 1024
# Budget the per-step VMEM working set against the smallest-VMEM generation
# (v7x: 64 MiB physical, 32 MiB scoped default); leave headroom for the compiler.
_VMEM_BUDGET = 44 * _MiB
_TB_CAP = 512     # row-tile cap; large tb cuts classifier-weight re-streaming
                  # (need tb ~>= 240/640/310 FLOP/byte on v5e/v6e/v7x to be MXU-bound).
_TC_CAP = 1024    # class-tile cap (multiple of 256 for v6e/v7x MXU, 128 for v5e).


def _round_up(x, m):
    return ((x + m - 1) // m) * m


def _vmem_bytes(tb, tc, D, P, out_bytes):
    """Estimated VMEM working set for one grid step (incl. pipeline buffers)."""
    return (2 * tb * D * 4             # feature tile (f32), double buffered
            + P * D * 2                # projector weight (bf16), Buffered(1) resident
            + 2 * tc * P * 2           # classifier weight tile (bf16), double buffered
            + 2 * tb * tc * out_bytes  # logits tile, double buffered
            + 2 * tb * P * out_bytes   # projected-feature tile, double buffered
            + tb * P * 2)              # bf16 projected-feature scratch


class FCParams(NamedTuple):
    w_proj: jax.Array   # [P, D]  bf16 projector Linear weight (PyTorch [out, in] layout)
    w_cls: jax.Array    # [Cp, P] bf16 classifier weight, padded to a multiple of class_tile
    num_classes: int    # original C (before padding)
    class_tile: int     # tc


def prepare_fc_weights(w_proj, w_cls, *, max_batch=_TB_CAP, out_bytes=4):
    """One-time (model-setup) weight preparation: lane-dense class padding + bf16 cast.

    The classifier weight is frozen in this incremental-learning module, so the
    padding and dtype casts are hoisted out of the per-call path -- a forward pass
    should not pay an extra HBM read+write of its largest tensor just to pad/cast it.
    """
    P, D = w_proj.shape
    C, Pw = w_cls.shape
    assert Pw == P, "w_cls inner dim must match projector output dim"

    # Classes padded to a multiple of 128 => unmasked, lane-dense logits stores.
    Cp = _round_up(C, 128)

    # Class tile: largest 128-multiple divisor of Cp under the cap that also fits the
    # VMEM budget with the worst-case row tile.  Shrink tc (not tb) under VMEM
    # pressure: tb controls classifier-weight re-streaming, tc only costs more steps.
    tb_max = _round_up(min(max_batch, _TB_CAP), 8)
    cap = _TC_CAP
    while cap > 128 and _vmem_bytes(tb_max, cap, D, P, out_bytes) > _VMEM_BUDGET:
        cap //= 2
    tc = 128
    start = (min(cap, Cp) // 128) * 128
    for cand in range(start, 127, -128):
        if Cp % cand == 0:
            tc = cand
            break

    w_cls_p = w_cls if Cp == C else jnp.pad(w_cls, ((0, Cp - C), (0, 0)))
    # bf16 weights: half the HBM weight traffic, full-rate MXU (f32 accumulation).
    # TODO(synk): fp8 wcls on v7x / int8 wcls on v5e-v6e would halve the dominant HBM
    # stream again whenever tb is below the compute-bound threshold.
    return FCParams(w_proj.astype(jnp.bfloat16), w_cls_p.astype(jnp.bfloat16), C, tc)


def _fc_kernel(scalar_ref, feat_ref, wproj_ref, wcls_ref, out_ref, feat_out_ref, f_sc):
    # scalar_ref  : SMEM (1,)          -- learnable scalar (scalar-prefetch operand)
    # feat_ref    : VMEM [tb, D]       -- input feature row tile
    # wproj_ref   : VMEM [P, D]        -- projector weight (resident, bf16, single-buffered)
    # wcls_ref    : VMEM [tc, P]       -- classifier weight tile (streamed, bf16)
    # out_ref     : VMEM [tb, tc]      -- logits tile
    # feat_out_ref: VMEM [tb, P]       -- projected features (resident across class tiles)
    # f_sc        : VMEM [tb, P] bf16  -- scalar-folded projected features for reuse
    #
    # NOTE: correctness of the compute-once pattern relies on the class axis
    # (pl.program_id(1)) being the LAST, sequential ("arbitrary") grid axis:
    # f_sc / feat_out_ref are written only at j == 0 and reused for every j.
    # Do not reorder the grid or mark this axis parallel / core-sharded.
    j = pl.program_id(1)

    @pl.when(j == 0)
    def _():
        x = feat_ref[...].astype(jnp.float32)
        # F.normalize: x / max(||x||, 1e-12) == x * rsqrt(max(||x||^2, 1e-24)); EUP rsqrt.
        ss = jnp.sum(x * x, axis=-1, keepdims=True)
        x = x * lax.rsqrt(jnp.maximum(ss, 1e-24))
        # Projector Linear (no bias): x @ Wp.T -- contract last dims of both operands
        # (PyTorch [out, in] layout consumed directly, no in-kernel transpose).
        f = lax.dot_general(
            x.astype(jnp.bfloat16), wproj_ref[...],
            dimension_numbers=(((1,), (1,)), ((), ())),
            preferred_element_type=jnp.float32)
        # The module returns the UNSCALED projected features.
        feat_out_ref[...] = f.astype(feat_out_ref.dtype)
        # Fold the learnable scalar into the resident activations once per row tile
        # (instead of scaling every [tb, tc] logits tile) and stash them in bf16 so
        # the inner class loop does nothing but the classifier MXU drain + store.
        f_sc[...] = (f * scalar_ref[0]).astype(f_sc.dtype)

    # Classifier: scalar * F.linear(f, Wc) == (scalar * f) @ Wc.T for this tile pair.
    out_ref[...] = lax.dot_general(
        f_sc[...], wcls_ref[...],
        dimension_numbers=(((1,), (1,)), ((), ())),
        preferred_element_type=jnp.float32).astype(out_ref.dtype)


def fc_forward(feature, scalar, params: FCParams, *, out_dtype=None, tb=None):
    """Fused FC.forward: returns (logits [B, C], {'features': [B, P]}).

    feature [B, D]; scalar [1]; params from prepare_fc_weights (frozen weights).
    out_dtype defaults to feature.dtype (module semantics); pass jnp.bfloat16 to halve
    the Bp x Cp logits writeback when downstream tolerates it.
    """
    B, D = feature.shape
    P, Dw = params.w_proj.shape
    Cp, Pw = params.w_cls.shape
    C, tc = params.num_classes, params.class_tile
    assert Dw == D and Pw == P and Cp % tc == 0

    out_dtype = feature.dtype if out_dtype is None else jnp.dtype(out_dtype)
    out_bytes = jnp.dtype(out_dtype).itemsize

    # Row tile: cover the whole (padded) batch when it is small so the classifier
    # weight streams from HBM exactly once (wcls HBM traffic = (Bp/tb) * Cp * P * 2 B);
    # otherwise cap at _TB_CAP.  Shrink only if the VMEM budget would be exceeded.
    if tb is None:
        tb = _round_up(min(B, _TB_CAP), 8)
        while tb > 8 and _vmem_bytes(tb, tc, D, P, out_bytes) > _VMEM_BUDGET:
            tb = _round_up(max(8, tb // 2), 8)
    Bp = _round_up(B, tb)
    feat_p = feature if Bp == B else jnp.pad(feature, ((0, Bp - B), (0, 0)))

    grid = (Bp // tb, Cp // tc)
    vmem_est = _vmem_bytes(tb, tc, D, P, out_bytes)
    # Default scoped VMEM (16 MiB v5e / 32 MiB v6e,v7x) is far below physical; raise it
    # for generation-sized tiles while staying under v7x's 64 MiB physical VMEM.
    vmem_limit = int(min(60 * _MiB, max(32 * _MiB, vmem_est + 8 * _MiB)))

    # Projector weight is resident (block index never changes): single pipeline buffer.
    try:
        wproj_spec = pl.BlockSpec((P, D), lambda i, j, s: (0, 0),
                                  pipeline_mode=pl.Buffered(1))
    except TypeError:  # older pallas without pipeline_mode kwarg
        wproj_spec = pl.BlockSpec((P, D), lambda i, j, s: (0, 0))

    flops = 2 * Bp * D * P + 2 * Bp * P * Cp
    bytes_accessed = (
        feat_p.size * feat_p.dtype.itemsize
        + params.w_proj.size * 2
        + (Bp // tb) * params.w_cls.size * 2      # wcls re-streamed once per row tile
        + Bp * Cp * out_bytes
        + Bp * P * out_bytes)

    logits, feats = pl.pallas_call(
        _fc_kernel,
        out_shape=(
            jax.ShapeDtypeStruct((Bp, Cp), out_dtype),
            jax.ShapeDtypeStruct((Bp, P), out_dtype),
        ),
        grid_spec=pltpu.PrefetchScalarGridSpec(
            num_scalar_prefetch=1,              # scalar -> SMEM, first kernel arg
            grid=grid,
            in_specs=[
                pl.BlockSpec((tb, D), lambda i, j, s: (i, 0)),   # feature row tile
                wproj_spec,                                      # projector weight (resident)
                pl.BlockSpec((tc, P), lambda i, j, s: (j, 0)),   # classifier weight tile
            ],
            out_specs=(
                pl.BlockSpec((tb, tc), lambda i, j, s: (i, j)),  # logits tile
                pl.BlockSpec((tb, P), lambda i, j, s: (i, 0)),   # features (resident over j)
            ),
            scratch_shapes=[pltpu.VMEM((tb, P), jnp.bfloat16)],
        ),
        compiler_params=pltpu.CompilerParams(
            dimension_semantics=("parallel", "arbitrary"),
            vmem_limit_bytes=vmem_limit),
        cost_estimate=pl.CostEstimate(
            flops=flops, transcendentals=Bp, bytes_accessed=bytes_accessed),
    )(scalar, feat_p, params.w_proj, params.w_cls)

    # TODO(synk): when Bp//tb == 1 on v7x only one of the two TensorCores gets work;
    # sharding the class axis across cores (core_map / redundant projection per half)
    # would recover up to ~2x for the small-B, huge-C inference case.
    return logits[:B, :C], {"features": feats[:B]}


def reference_forward(feature, w_proj, w_cls, scalar):
    x = feature.astype(jnp.float32)
    n = jnp.sqrt(jnp.sum(x * x, axis=-1, keepdims=True))
    x = x / jnp.maximum(n, 1e-12)
    f = x @ w_proj.T
    out = scalar[0] * (f @ w_cls.T)
    return out, f


if __name__ == "__main__":
    key = jax.random.PRNGKey(0)
    k1, k2, k3 = jax.random.split(key, 3)

    # Small shapes consistent with the module (feature_dim=D, weight [C, P]).
    # B=12 / C=200 deliberately non-multiples of the tiles to exercise padding.
    B, D, P, C = 12, 256, 128, 200

    feature = jax.random.normal(k1, (B, D), dtype=jnp.float32)
    w_proj = jax.random.normal(k2, (P, D), dtype=jnp.float32) * 0.05   # projector Linear weight
    w_cls = jax.random.normal(k3, (C, P), dtype=jnp.float32) * 0.05    # (frozen) class weight
    scalar = jnp.array([1.25], dtype=jnp.float32)                      # nn.Parameter(tensor(1.0))-like

    # One-time weight prep (lane-dense padding + bf16 cast), hoisted out of the forward path.
    params = prepare_fc_weights(w_proj, w_cls)

    logits, aux = fc_forward(feature, scalar, params)
    jax.block_until_ready((logits, aux["features"]))

    ref_logits, ref_feats = reference_forward(feature, w_proj, w_cls, scalar)

    assert logits.shape == (B, C) and aux["features"].shape == (B, P)
    # bf16 matmul operands with f32 accumulation -> looser tolerance than pure f32.
    assert jnp.allclose(logits, ref_logits, atol=1e-2, rtol=1e-2), "logits mismatch"
    assert jnp.allclose(aux["features"], ref_feats, atol=1e-2, rtol=1e-2), "features mismatch"

    # TODO(synk): is_eculi_logit branch (-torch.cdist) and the 'bottle'/'random'
    # projector variants are not exercised; eculi could be fused in the same kernel
    # as ||f||^2 - 2 f@W.T + ||w||^2 if needed.
    print("KERNEL_OK")
</pallas_src>

<mosaic_0001>
module attributes {stable_mosaic.version = 11 : i64} {
  func.func @_fc_kernel(%arg0: i32, %arg1: i32, %arg2: memref<1xf32, #tpu.memory_space<smem>>, %arg3: memref<16x256xf32, #tpu.memory_space<vmem>>, %arg4: memref<128x256xbf16, #tpu.memory_space<vmem>>, %arg5: memref<256x128xbf16, #tpu.memory_space<vmem>>, %arg6: memref<16x256xf32, #tpu.memory_space<vmem>>, %arg7: memref<16x128xf32, #tpu.memory_space<vmem>>, %arg8: memref<16x128xbf16, #tpu.memory_space<vmem>>) attributes {dimension_semantics = [#tpu.dimension_semantics<parallel>, #tpu.dimension_semantics<arbitrary>], iteration_bounds = array<i64: 1, 1>, scalar_prefetch = 1 : i64, scratch_operands = 1 : i64, tpu.core_type = #tpu.core_type<tc>, window_params = [{transform_indices = @transform_0, window_bounds = array<i64: 16, 256>}, {pipeline_mode = #tpu.pipeline_mode<synchronous>, transform_indices = @transform_1, window_bounds = array<i64: 128, 256>}, {transform_indices = @transform_2, window_bounds = array<i64: 256, 128>}, {transform_indices = @transform_3, window_bounds = array<i64: 16, 256>}, {transform_indices = @transform_4, window_bounds = array<i64: 16, 128>}]} {
    %c0_i32 = arith.constant 0 : i32
    %0 = arith.cmpi eq, %arg1, %c0_i32 : i32
    %1 = arith.extui %0 : i1 to i32
    %c0_i32_0 = arith.constant 0 : i32
    %2 = arith.cmpi ne, %1, %c0_i32_0 : i32
    scf.if %2 {
      %c0_6 = arith.constant 0 : index
      %c0_7 = arith.constant 0 : index
      %7 = vector.load %arg3[%c0_6, %c0_7] : memref<16x256xf32, #tpu.memory_space<vmem>>, vector<16x256xf32>
      %8 = arith.mulf %7, %7 : vector<16x256xf32>
      %cst_8 = arith.constant dense<0.000000e+00> : vector<16xf32>
      %9 = vector.multi_reduction <add>, %8, %cst_8 [1] : vector<16x256xf32> to vector<16xf32>
      %10 = vector.shape_cast %9 : vector<16xf32> to vector<16x1xf32>
      %cst_9 = arith.constant 1.000000e-24 : f32
      %11 = vector.broadcast %cst_9 : f32 to vector<16x1xf32>
      %12 = arith.maximumf %10, %11 : vector<16x1xf32>
      %13 = math.rsqrt %12 : vector<16x1xf32>
      %14 = vector.broadcast %13 : vector<16x1xf32> to vector<16x256xf32>
      %15 = arith.mulf %7, %14 : vector<16x256xf32>
      %16 = arith.truncf %15 : vector<16x256xf32> to vector<16x256xbf16>
      %c0_10 = arith.constant 0 : index
      %c0_11 = arith.constant 0 : index
      %17 = vector.load %arg4[%c0_10, %c0_11] : memref<128x256xbf16, #tpu.memory_space<vmem>>, vector<128x256xbf16>
      %cst_12 = arith.constant dense<0.000000e+00> : vector<16x128xf32>
      %18 = tpu.matmul %16, %17, %cst_12 {dimension_numbers = #tpu.dot_dimension_numbers<[1], [1], [0], [0], [0, 0, 1, 0], [], []>} : vector<16x256xbf16>, vector<128x256xbf16>, vector<16x128xf32> -> vector<16x128xf32>
      %c0_13 = arith.constant 0 : index
      %c0_14 = arith.constant 0 : index
      %19 = vector.load %arg7[%c0_13, %c0_14] : memref<16x128xf32, #tpu.memory_space<vmem>>, vector<16x128xf32>
      tpu.vector_store %arg7[%c0_13, %c0_14], %18 {strides = array<i32>} : memref<16x128xf32, #tpu.memory_space<vmem>>, vector<16x128xf32>,
      %c0_15 = arith.constant 0 : index
      %20 = memref.load %arg2[%c0_15] : memref<1xf32, #tpu.memory_space<smem>>
      %21 = vector.broadcast %20 : f32 to vector<16x128xf32>
      %22 = arith.mulf %18, %21 : vector<16x128xf32>
      %23 = arith.truncf %22 : vector<16x128xf32> to vector<16x128xbf16>
      %c0_16 = arith.constant 0 : index
      %c0_17 = arith.constant 0 : index
      %24 = vector.load %arg8[%c0_16, %c0_17] : memref<16x128xbf16, #tpu.memory_space<vmem>>, vector<16x128xbf16>
      tpu.vector_store %arg8[%c0_16, %c0_17], %23 {strides = array<i32>} : memref<16x128xbf16, #tpu.memory_space<vmem>>, vector<16x128xbf16>,
    } else {
    }
    %c0 = arith.constant 0 : index
    %c0_1 = arith.constant 0 : index
    %3 = vector.load %arg8[%c0, %c0_1] : memref<16x128xbf16, #tpu.memory_space<vmem>>, vector<16x128xbf16>
    %c0_2 = arith.constant 0 : index
    %c0_3 = arith.constant 0 : index
    %4 = vector.load %arg5[%c0_2, %c0_3] : memref<256x128xbf16, #tpu.memory_space<vmem>>, vector<256x128xbf16>
    %cst = arith.constant dense<0.000000e+00> : vector<16x256xf32>
    %5 = tpu.matmul %3, %4, %cst {dimension_numbers = #tpu.dot_dimension_numbers<[1], [1], [0], [0], [0, 0, 1, 0], [], []>} : vector<16x128xbf16>, vector<256x128xbf16>, vector<16x256xf32> -> vector<16x256xf32>
    %c0_4 = arith.constant 0 : index
    %c0_5 = arith.constant 0 : index
    %6 = vector.load %arg6[%c0_4, %c0_5] : memref<16x256xf32, #tpu.memory_space<vmem>>, vector<16x256xf32>
    tpu.vector_store %arg6[%c0_4, %c0_5], %5 {strides = array<i32>} : memref<16x256xf32, #tpu.memory_space<vmem>>, vector<16x256xf32>,
    return
  }
  func.func @transform_0(%arg0: i32, %arg1: i32, %arg2: memref<1xf32, #tpu.memory_space<smem>>) -> (i32, i32) {
    %c0_i32 = arith.constant 0 : i32
    %c0_i32_0 = arith.constant 0 : i32
    return %arg0, %c0_i32 : i32, i32
  }
  func.func @transform_1(%arg0: i32, %arg1: i32, %arg2: memref<1xf32, #tpu.memory_space<smem>>) -> (i32, i32) {
    %c0_i32 = arith.constant 0 : i32
    %c0_i32_0 = arith.constant 0 : i32
    %c0_i32_1 = arith.constant 0 : i32
    return %c0_i32, %c0_i32_0 : i32, i32
  }
  func.func @transform_2(%arg0: i32, %arg1: i32, %arg2: memref<1xf32, #tpu.memory_space<smem>>) -> (i32, i32) {
    %c0_i32 = arith.constant 0 : i32
    %c0_i32_0 = arith.constant 0 : i32
    return %arg1, %c0_i32 : i32, i32
  }
  func.func @transform_3(%arg0: i32, %arg1: i32, %arg2: memref<1xf32, #tpu.memory_space<smem>>) -> (i32, i32) {
    %c0_i32 = arith.constant 0 : i32
    return %arg0, %arg1 : i32, i32
  }
  func.func @transform_4(%arg0: i32, %arg1: i32, %arg2: memref<1xf32, #tpu.memory_space<smem>>) -> (i32, i32) {
    %c0_i32 = arith.constant 0 : i32
    %c0_i32_0 = arith.constant 0 : i32
    return %arg0, %c0_i32 : i32, i32
  }
}

</mosaic_0001>

<bundles_post_ra>
// kernel: tpu_custom_call.1
= control target key start
LH: loop header
LB: loop body
LE: loop exit
PB: predicated region body
PF: predicated region fallthrough
CT: control target
= control target key end

     0   :  { %12 = vsyncpa [#allocation6], 0  ;;  %s804_s0 = inlined_call_operand.<no memory space> [shape: f32[1], index: 0, kind: input, shape index: {}]   ;;  %s805_s1 = inlined_call_operand.hbm [shape: f32[16,256], index: 1, kind: input, shape index: {}]   ;;  %s806_s2 = inlined_call_operand.hbm [shape: bf16[128,256], index: 2, kind: input, shape index: {}]   ;;  %s807_s3 = inlined_call_operand.hbm [shape: bf16[256,128], index: 3, kind: input, shape index: {}]   ;;  %s808_s4 = inlined_call_operand.hbm [shape: f32[16,256], index: 4, kind: output, shape index: {0}]   ;;  %s809_s5 = inlined_call_operand.hbm [shape: f32[16,128], index: 5, kind: output, shape index: {1}]  }
   0x1   :  { %13 = vsyncpa [#allocation9], 0 }
   0x2   :  { %14 = vsyncpa [#allocation7], 0 }
   0x3   :  { %15 = vsyncpa [#allocation13], 0  ;;  %s668_s18 = smov [#allocation8]   ;;  %s550_s22 = scalar_lea.hbm %s806_s2, 2048 }
   0x4   :  { %s33_s19 = sshll.u32 %s668_s18, 4  ;;  %p551_p0 = scmp.ne.s32.totalorder %s806_s2, %s550_s22  ;;  %s34_s19 = int_to_ptr.vmem [resolvable:$true] %s33_s19 }
   0x5   :  { %p554_p1 = scmp.lt.u32.totalorder %s550_s22, %s806_s2 }
   0x7   :  { %p556_p2 = pnand %p554_p1, %p551_p0 }
   0x9   :  { %559 = shalt.err (!%p556_p2)
}
   0xa   :  { %s560_s27 = scalar_lea.vmem %s34_s19, 2048  ;;  %p565_p4 = scmp.lt.s32.totalorder %s34_s19, %s34_s19 }
   0xb   :  { %p561_p3 = scmp.ne.s32.totalorder %s34_s19, %s560_s27  ;;  %p566_p5 = scmp.lt.s32.totalorder %s560_s27, %s560_s27 }
   0xd   :  { %p567_p6 = por %p566_p5, %p565_p4 }
   0xf   :  { %p568_p7 = pnand %p567_p6, %p561_p3 }
  0x11   :  { %571 = shalt.err (!%p568_p7)
}
  0x12   :  { %s669_s28 = smov 128   ;;  %s670_s29 = smov 8  }
  0x13   :  { %39 = dma.hbm_to_vmem [thread:$0]  %s806_s2, 2048, %s34_s19, [#allocation9], %s669_s28, %s669_s28, %s670_s29  }
  0x14   :  { %s671_s7 = smov [#allocation5]   ;;  %s572_s11 = scalar_lea.hbm %s805_s1, 512 }
  0x15   :  { %s21_s8 = sshll.u32 %s671_s7, 4  ;;  %p573_p8 = scmp.ne.s32.totalorder %s805_s1, %s572_s11  ;;  %s22_s8 = int_to_ptr.vmem [resolvable:$true] %s21_s8 }
  0x16   :  { %p576_p9 = scmp.lt.u32.totalorder %s572_s11, %s805_s1 }
  0x18   :  { %p578_p10 = pnand %p576_p9, %p573_p8 }
  0x1a   :  { %581 = shalt.err (!%p578_p10)
}
  0x1b   :  { %s582_s16 = scalar_lea.vmem %s22_s8, 512  ;;  %p587_p12 = scmp.lt.s32.totalorder %s22_s8, %s22_s8 }
  0x1c   :  { %p583_p11 = scmp.ne.s32.totalorder %s22_s8, %s582_s16  ;;  %p588_p13 = scmp.lt.s32.totalorder %s582_s16, %s582_s16 }
  0x1e   :  { %p589_p0 = por %p588_p13, %p587_p12 }
  0x20   :  { %p590_p1 = pnand %p589_p0, %p583_p11 }
  0x22   :  { %593 = shalt.err (!%p590_p1)
}
  0x23   :  { %s672_s2 = smov 256   ;;  %s673_s17 = smov 16  }
  0x24   :  { %27 = dma.hbm_to_vmem [thread:$0]  %s805_s1, 512, %s22_s8, [#allocation6], %s672_s2, %s672_s2, %s673_s17  }
  0x25   :  { %s674_s20 = smov [#allocation10]   ;;  %s594_s24 = scalar_lea.hbm %s807_s3, 2048 }
  0x26   :  { %s45_s21 = sshll.u32 %s674_s20, 4  ;;  %p595_p2 = scmp.ne.s32.totalorder %s807_s3, %s594_s24  ;;  %s46_s21 = int_to_ptr.vmem [resolvable:$true] %s45_s21 }
  0x27   :  { %p598_p3 = scmp.lt.u32.totalorder %s594_s24, %s807_s3 }
  0x29   :  { %p600_p4 = pnand %p598_p3, %p595_p2 }
  0x2b   :  { %603 = shalt.err (!%p600_p4)
}
  0x2c   :  { %s604_s6 = scalar_lea.vmem %s46_s21, 2048  ;;  %p609_p6 = scmp.lt.s32.totalorder %s46_s21, %s46_s21 }
  0x2d   :  { %p605_p5 = scmp.ne.s32.totalorder %s46_s21, %s604_s6  ;;  %p610_p7 = scmp.lt.s32.totalorder %s604_s6, %s604_s6 }
  0x2f   :  { %p611_p8 = por %p610_p7, %p609_p6 }
  0x31   :  { %p612_p9 = pnand %p611_p8, %p605_p5 }
  0x33   :  { %615 = shalt.err (!%p612_p9)
}
  0x34   :  { %s675_s1 = smov 64   ;;  %s676_s7 = smov 4  }
  0x35   :  { %51 = dma.hbm_to_vmem [thread:$0]  %s807_s3, 2048, %s46_s21, [#allocation9], %s675_s1, %s675_s1, %s676_s7  }
  0x36   :  { %660 = dma.done.wait [#allocation6], 512  }
  0x37   :  { %661 = vsyncadd [#allocation6], 4294966784 }
  0x38   :  { %662 = dma.done.wait [#allocation9], 4096  }
  0x39   :  { %663 = vsyncadd [#allocation9], 4294963200  ;;  %v751_v0 = vld [vmem:[#allocation5] sm:$0xff]  ;;  %v753_v1 = vld [vmem:[#allocation5 + $0x8] sm:$0xff]  ;;  %v230_v55 = vstv %s804_s0  ;;  %s677_s11 = smov [#allocation12]  }
  0x3a   :  { %v755_v2 = vld [vmem:[#allocation5 + $0x10] sm:$0xff]  ;;  %v70_v3 = vmul.f32 %v751_v0, %v751_v0  ;;  %v71_v4 = vmul.f32 %v753_v1, %v753_v1  ;;  %v761_v5 = vld [vmem:[#allocation5 + $0x18] sm:$0xff]  ;;  %v506_v8 = vld [vmem:[#allocation8 + $0x4] ss:$8 sps:$4 sm:$0xff]   ;;  %s428_s12 = sshll.u32 %s677_s11, 4  ;;  %s429_s12 = int_to_ptr.vmem [resolvable:$true] %s428_s12 }
  0x3b   :  { %v72_v6 = vmul.f32 %v755_v2, %v755_v2  ;;  %v73_v7 = vmul.f32 %v761_v5, %v761_v5  ;;  %v508_v9 = vld [vmem:[#allocation8] ss:$8 sps:$4 sm:$0xff]   ;;  %v509_v11 = vld [vmem:[#allocation8 + $0x14] ss:$8 sps:$4 sm:$0xff]   ;;  %186 = vmatprep.subr.bf16.mxu0 %v506_v8  ;;  %v511_v13 = vld [vmem:[#allocation8 + $0x10] ss:$8 sps:$4 sm:$0xff]   ;;  %p621_p11 = scmp.lt.s32.totalorder %s429_s12, %s429_s12 }
  0x3c   :  { %v74_v10 = vadd.f32 %v71_v4, %v70_v3  ;;  %187 = vmatpush1.bf16.xpose.msra.mxu0 %v508_v9  ;;  %v512_v14 = vld [vmem:[#allocation8 + $0x24] ss:$8 sps:$4 sm:$0xff]   ;;  %v514_v15 = vld [vmem:[#allocation8 + $0x20] ss:$8 sps:$4 sm:$0xff]   ;;  %v515_v16 = vld [vmem:[#allocation8 + $0x34] ss:$8 sps:$4 sm:$0xff]  }
  0x3d   :  { %v77_v12 = vadd.f32 %v73_v7, %v72_v6  ;;  %188 = vmatprep.subr.bf16.mxu0 %v509_v11  ;;  %v517_v17 = vld [vmem:[#allocation8 + $0x30] ss:$8 sps:$4 sm:$0xff]   ;;  %v518_v18 = vld [vmem:[#allocation8 + $0x44] ss:$8 sps:$4 sm:$0xff]   ;;  %v520_v19 = vld [vmem:[#allocation8 + $0x40] ss:$8 sps:$4 sm:$0xff]  }
  0x3e   :  { %75 = vadd.xlane.f32.xlu0 %v74_v10  ;;  %v521_v20 = vld [vmem:[#allocation8 + $0x54] ss:$8 sps:$4 sm:$0xff]   ;;  %v523_v21 = vld [vmem:[#allocation8 + $0x50] ss:$8 sps:$4 sm:$0xff]   ;;  %v530_v22 = vld [vmem:[#allocation10 + $0x40] sm:$0xff]   ;;  %s616_s13 = scalar_lea.vmem %s429_s12, 256 }
  0x3f   :  { %v531_v23 = vld [vmem:[#allocation10] sm:$0xff]   ;;  %v532_v24 = vld [vmem:[#allocation10 + $0x48] sm:$0xff]   ;;  %477 = vmatprep.subr.bf16.mxu1 %v530_v22  ;;  %v534_v28 = vld [vmem:[#allocation10 + $0x50] sm:$0xff]   ;;  %p617_p10 = scmp.ne.s32.totalorder %s429_s12, %s616_s13  ;;  %p622_p12 = scmp.lt.s32.totalorder %s616_s13, %s616_s13 }
  0x40   :  { %v524_v25 = vld [vmem:[#allocation8 + $0x64] ss:$8 sps:$4 sm:$0xff]   ;;  %478 = vmatpush3.bf16.xpose.msra.mxu1 %v531_v23  ;;  %v526_v27 = vld [vmem:[#allocation8 + $0x60] ss:$8 sps:$4 sm:$0xff]   ;;  %v527_v29 = vld [vmem:[#allocation8 + $0x74] ss:$8 sps:$4 sm:$0xff]  }
  0x41   :  { %479 = vmatprep.subr.bf16.mxu1 %v532_v24  ;;  %v533_v26 = vld [vmem:[#allocation10 + $0x8] sm:$0xff]   ;;  %v535_v30 = vld [vmem:[#allocation10 + $0x10] sm:$0xff]   ;;  %v536_v32 = vld [vmem:[#allocation10 + $0x58] sm:$0xff]   ;;  %p623_p13 = por %p622_p12, %p621_p11 }
  0x42   :  { %78 = vadd.xlane.f32.xlu0 %v77_v12  ;;  %v529_v31 = vld [vmem:[#allocation8 + $0x70] ss:$8 sps:$4 sm:$0xff]   ;;  %v538_v34 = vld [vmem:[#allocation10 + $0x60] sm:$0xff]   ;;  %v540_v36 = vld [vmem:[#allocation10 + $0x68] sm:$0xff]  }
  0x43   :  { %v537_v33 = vld [vmem:[#allocation10 + $0x18] sm:$0xff]   ;;  %v539_v35 = vld [vmem:[#allocation10 + $0x20] sm:$0xff]   ;;  %v541_v37 = vld [vmem:[#allocation10 + $0x28] sm:$0xff]   ;;  %p624_p0 = pnand %p623_p13, %p617_p10 }
  0x44   :  { %189 = vmatpush1.bf16.xpose.msra.mxu0 %v511_v13  ;;  %v542_v38 = vld [vmem:[#allocation10 + $0x70] sm:$0xff]   ;;  %v544_v52 = vld [vmem:[#allocation10 + $0x78] sm:$0xff]  }
  0x45   :  { %190 = vmatprep.subr.bf16.mxu0 %v512_v14  ;;  %v543_v39 = vld [vmem:[#allocation10 + $0x30] sm:$0xff]   ;;  %v545_v53 = vld [vmem:[#allocation10 + $0x38] sm:$0xff]  }
  0x48   :  { %480 = vmatpush3.bf16.xpose.msra.mxu1 %v533_v26 }
  0x49   :  { %481 = vmatprep.subr.bf16.mxu1 %v534_v28 }
  0x4c   :  { %191 = vmatpush1.bf16.xpose.msra.mxu0 %v514_v15 }
  0x4d   :  { %192 = vmatprep.subr.bf16.mxu0 %v515_v16 }
  0x50   :  { %482 = vmatpush3.bf16.xpose.msra.mxu1 %v535_v30 }
  0x51   :  { %483 = vmatprep.subr.bf16.mxu1 %v536_v32 }
  0x54   :  { %193 = vmatpush1.bf16.xpose.msra.mxu0 %v517_v17 }
  0x55   :  { %194 = vmatprep.subr.bf16.mxu0 %v518_v18 }
  0x58   :  { %484 = vmatpush3.bf16.xpose.msra.mxu1 %v537_v33 }
  0x59   :  { %485 = vmatprep.subr.bf16.mxu1 %v538_v34 }
  0x5c   :  { %195 = vmatpush1.bf16.xpose.msra.mxu0 %v520_v19 }
  0x5d   :  { %196 = vmatprep.subr.bf16.mxu0 %v521_v20 }
  0x60   :  { %486 = vmatpush3.bf16.xpose.msra.mxu1 %v539_v35 }
  0x61   :  { %487 = vmatprep.subr.bf16.mxu1 %v540_v36 }
  0x64   :  { %197 = vmatpush1.bf16.xpose.msra.mxu0 %v523_v21 }
  0x65   :  { %198 = vmatprep.subr.bf16.mxu0 %v524_v25 }
  0x68   :  { %488 = vmatpush3.bf16.xpose.msra.mxu1 %v541_v37 }
  0x69   :  { %489 = vmatprep.subr.bf16.mxu1 %v542_v38 }
  0x6c   :  { %199 = vmatpush1.bf16.xpose.msra.mxu0 %v526_v27 }
  0x6d   :  { %200 = vmatprep.subr.bf16.mxu0 %v527_v29 }
  0x70   :  { %490 = vmatpush3.bf16.xpose.msra.mxu1 %v543_v39 }
  0x71   :  { %491 = vmatprep.subr.bf16.mxu1 %v544_v52 }
  0x74   :  { %201 = vmatpush1.bf16.xpose.msra.mxu0 %v529_v31 }
  0x78   :  { %492 = vmatpush3.bf16.xpose.msra.mxu1 %v545_v53 }
  0xcb   :  { %v76_v40 = vpop.xlane.xlu0 %75 }
  0xcc   :  { %v80_v41 = vmax.f32 %v76_v40, 1e-24 }
  0xce   :  { %546 = vrsqrt.f32 %v80_v41 }
  0xcf   :  { %v79_v42 = vpop.xlane.xlu0 %78 }
  0xd0   :  { %v81_v43 = vmax.f32 %v79_v42, 1e-24 }
  0xd2   :  { %548 = vrsqrt.f32 %v81_v43 }
  0xd8   :  { %v547_v44 = vpop.eup %546 }
  0xd9   :  { %v85_v46 = vmul.f32 %v547_v44, %v753_v1  ;;  %v84_v48 = vmul.f32 %v547_v44, %v751_v0 }
  0xdc   :  { %v549_v45 = vpop.eup %548 }
  0xdd   :  { %v87_v47 = vmul.f32 %v549_v45, %v761_v5  ;;  %v86_v49 = vmul.f32 %v549_v45, %v755_v2 }
  0xdf   :  { %v89_v50 = vpack.c.bf16 %v87_v47, %v85_v46  ;;  %v88_v51 = vpack.c.bf16 %v86_v49, %v84_v48 }
  0xe1   :  { %218 = vmatprep.mubr.bf16.mxu0 %v89_v50 }
  0xe2   :  { %219 = vmatmul.mubr.bf16.vlgmr.msra.gmra.mrb[0].mxu0 %v88_v51 }
 0x1b5   :  { %v220_v54 = vpop.f32.mrb[0].mxu0 }
 0x1b6   :  { %227 = vst [vmem:[#allocation12] sm:$0xff] %v220_v54  ;;  %v222_v56 = vpop.f32.mrb[1].mxu0  ;;  %v231_v58 = vmul.f32 %v230_v55, %v220_v54 }
 0x1b7   :  { %v223_v57 = vpop.f32.mrb[2].mxu0 }
 0x1b8   :  { %228 = vst [vmem:[#allocation12 + $0x8] sm:$0xff] %v223_v57  ;;  %v232_v59 = vmul.f32 %v230_v55, %v223_v57  ;;  %v225_v60 = vpop.f32.mrb[3].mxu0 }
 0x1ba   :  { %v233_v61 = vpack.c.bf16 %v232_v59, %v231_v58 }
 0x1bc   :  { %493 = vmatprep.mubr.bf16.mxu1 %v233_v61 }
 0x1bd   :  { %494 = vmatmul.mubr.bf16.vlgmr.msra.gmra.mrb[0].mxu1 %v233_v61 }
 0x1be   :  { %627 = shalt.err (!%p624_p0)
}
 0x1bf   :  { %s628_s15 = scalar_lea.hbm %s809_s5, 256 }
 0x1c0   :  { %p629_p1 = scmp.ne.s32.totalorder %s809_s5, %s628_s15  ;;  %p632_p2 = scmp.lt.u32.totalorder %s628_s15, %s809_s5 }
 0x1c2   :  { %p634_p3 = pnand %p632_p2, %p629_p1 }
 0x1c4   :  { %637 = shalt.err (!%p634_p3)
}
 0x1c5   :  { %434 = dma.vmem_to_hbm [thread:$0]  %s429_s12, 256, %s809_s5, [#allocation13], %s669_s28, %s669_s28, %s670_s29  }
 0x1c6   :  { %s678_s23 = smov [#allocation11]  }
 0x1c7   :  { %s416_s24 = sshll.u32 %s678_s23, 4  ;;  %s417_s24 = int_to_ptr.vmem [resolvable:$true] %s416_s24 }
 0x1c8   :  { %s638_s25 = scalar_lea.vmem %s417_s24, 512  ;;  %p643_p5 = scmp.lt.s32.totalorder %s417_s24, %s417_s24 }
 0x1c9   :  { %p639_p4 = scmp.ne.s32.totalorder %s417_s24, %s638_s25  ;;  %p644_p6 = scmp.lt.s32.totalorder %s638_s25, %s638_s25 }
 0x1cb   :  { %p645_p7 = por %p644_p6, %p643_p5 }
 0x1cd   :  { %p646_p8 = pnand %p645_p7, %p639_p4 }
 0x290   :  { %v398_v62 = vpop.f32.mrb[0].mxu1 }
 0x291   :  { %407 = vst [vmem:[#allocation11] sm:$0xff] %v398_v62  ;;  %v400_v63 = vpop.f32.mrb[1].mxu1 }
 0x292   :  { %408 = vst [vmem:[#allocation11 + $0x8] sm:$0xff] %v400_v63  ;;  %v402_v0 = vpop.f32.mrb[2].mxu1 }
 0x293   :  { %409 = vst [vmem:[#allocation11 + $0x10] sm:$0xff] %v402_v0  ;;  %v404_v1 = vpop.f32.mrb[3].mxu1 }
 0x294   :  { %410 = vst [vmem:[#allocation11 + $0x18] sm:$0xff] %v404_v1 }
 0x295   :  { %649 = shalt.err (!%p646_p8)
}
 0x296   :  { %s650_s28 = scalar_lea.hbm %s808_s4, 512 }
 0x297   :  { %p651_p9 = scmp.ne.s32.totalorder %s808_s4, %s650_s28  ;;  %p654_p10 = scmp.lt.u32.totalorder %s650_s28, %s808_s4 }
 0x299   :  { %p656_p11 = pnand %p654_p10, %p651_p9 }
 0x29b   :  { %659 = shalt.err (!%p656_p11)
}
 0x29c   :  { %422 = dma.vmem_to_hbm [thread:$0]  %s417_s24, 512, %s808_s4, [#allocation7], %s672_s2, %s672_s2, %s673_s17  }
 0x29d   :  { %664 = dma.done.wait [#allocation7], 512  }
 0x29e   :  { %665 = vsyncadd [#allocation7], 4294966784 }
 0x29f   :  { %666 = dma.done.wait [#allocation13], 256  }
 0x2a0   :  { %667 = vsyncadd [#allocation13], 4294967040 }
 0x2a1   :  { %441 = vsyncpa [#allocation6], 1 }
 0x2a2   :  { %442 = vsyncpa [#allocation9], 1 }
 0x2a3   :  { %443 = vsyncpa [#allocation7], 1 }
 0x2a4   :  { %444 = vsyncpa [#allocation13], 1 }

</bundles_post_ra>
